<compile_context>
chip_gen: v5e
topology: v5e:2x2
jax: 0.10.0
libtpu: 0.0.40
codegen_flags: <defaults>
</compile_context>

<pallas_src>
import functools

import jax
import jax.numpy as jnp
import numpy as np
from jax import lax
from jax.experimental import pallas as pl
from jax.experimental.pallas import tpu as pltpu


def _round_up(x, m):
    return (x + m - 1) // m * m


# ----------------------------------------------------------------------------
# Kernels
# ----------------------------------------------------------------------------
def _linear_embed_kernel(x_ref, w_ref, b_ref, mask_ref, o_ref, *, apply_mask):
    # x_ref:    (bm, p*d_in)    bf16 batch tile (p batch rows packed per row)
    # w_ref:    (p*d_in, p*d_emb) bf16 block-diagonal packed weight (invariant)
    # b_ref:    (1, p*d_emb)    f32 packed bias
    # mask_ref: (bm, p*d_emb)   bf16 packed mask
    # o_ref:    (bm, p*d_emb)   f32, lane-dense (p*d_emb is a multiple of 128 when packed)
    out = jnp.dot(x_ref[...], w_ref[...], preferred_element_type=jnp.float32)
    out = out + b_ref[...]
    if apply_mask:
        out = out * mask_ref[...].astype(jnp.float32)   # elementwise math kept in f32 (v5e)
    o_ref[...] = out.astype(o_ref.dtype)


def _lookup_embed_kernel(ids_ref, table_ref, mask_ref, o_ref, acc_ref, *, apply_mask):
    # grid = (batch tiles, vocab tiles); vocab is the reduction ("arbitrary") axis.
    # ids_ref:   (bm, 1)        int32
    # table_ref: (tV, d_emb)    bf16 vocab tile
    # mask_ref:  (bm, 1)        bf16
    # o_ref:     (bm, d_emb)    f32 (resident across the vocab axis)
    # acc_ref:   (bm, d_emb)    f32 VMEM accumulator
    j = pl.program_id(1)

    @pl.when(j == 0)
    def _init():
        acc_ref[...] = jnp.zeros_like(acc_ref)

    ids = ids_ref[...]                                   # (bm, 1)
    bm = ids.shape[0]
    tv = table_ref.shape[0]
    base = j * tv
    # One-hot gather against this vocab tile only (bf16 one-hot -> MXU-friendly on all chips;
    # no int MXU path needed, which matters on v7x).
    iota = lax.broadcasted_iota(jnp.int32, (bm, tv), 1) + base
    onehot = (iota == ids).astype(table_ref.dtype)       # (bm, tV)
    acc_ref[...] += jnp.dot(onehot, table_ref[...],
                            preferred_element_type=jnp.float32)

    @pl.when(j == pl.num_programs(1) - 1)
    def _finalize():
        out = acc_ref[...]
        if apply_mask:
            out = out * mask_ref[...].astype(jnp.float32)   # (bm,1) broadcasts over d_emb
        o_ref[...] = out.astype(o_ref.dtype)


# ----------------------------------------------------------------------------
# Wrappers
# ----------------------------------------------------------------------------
def features_embedding_linear(x, w_t, b, mask, apply_mask=False, *, bm=256,
                              compute_dtype=jnp.bfloat16, out_dtype=jnp.float32):
    """expand=False path. x:(B,d_in), w_t:(d_in,d_emb) (pre-transposed), b:(d_emb,), mask:(B,d_emb)."""
    B, d_in = x.shape
    d_emb = w_t.shape[1]

    # Lane-packing factor so the output block's last dim is a multiple of 128.
    if d_emb % 128 == 0:
        p = 1
    elif 128 % d_emb == 0:
        p = 128 // d_emb
    else:
        p = 1  # TODO(synk): pad d_emb to a multiple of 128 for lane-dense stores in this case.

    n_rows = -(-B // p)                         # packed rows needed
    bm_eff = min(bm, _round_up(n_rows, 8))      # big tiles for real workloads, clamped for demos
    n_pad = _round_up(n_rows, bm_eff)
    b_pad = n_pad * p

    x_p = jnp.zeros((b_pad, d_in), compute_dtype).at[:B].set(x.astype(compute_dtype))
    m_p = jnp.zeros((b_pad, d_emb), compute_dtype).at[:B].set(mask.astype(compute_dtype))

    # Block-diagonal packed weight: p batch rows share one 128-wide output row.
    wc = w_t.astype(compute_dtype)
    w_pack = jnp.zeros((p * d_in, p * d_emb), compute_dtype)
    for j in range(p):
        w_pack = w_pack.at[j * d_in:(j + 1) * d_in, j * d_emb:(j + 1) * d_emb].set(wc)
    b_pack = jnp.tile(b.astype(jnp.float32), p).reshape(1, p * d_emb)

    x_pk = x_p.reshape(n_pad, p * d_in)
    m_pk = m_p.reshape(n_pad, p * d_emb)

    kernel = functools.partial(_linear_embed_kernel, apply_mask=apply_mask)
    out = pl.pallas_call(
        kernel,
        out_shape=jax.ShapeDtypeStruct((n_pad, p * d_emb), out_dtype),
        grid_spec=pltpu.PrefetchScalarGridSpec(
            num_scalar_prefetch=0,
            grid=(n_pad // bm_eff,),
            in_specs=[
                pl.BlockSpec((bm_eff, p * d_in), lambda i: (i, 0)),
                pl.BlockSpec((p * d_in, p * d_emb), lambda i: (0, 0)),  # invariant weight
                pl.BlockSpec((1, p * d_emb), lambda i: (0, 0)),         # invariant bias
                pl.BlockSpec((bm_eff, p * d_emb), lambda i: (i, 0)),
            ],
            out_specs=pl.BlockSpec((bm_eff, p * d_emb), lambda i: (i, 0)),
        ),
        compiler_params=pltpu.CompilerParams(
            dimension_semantics=("parallel",),          # megacore-shardable batch axis
            vmem_limit_bytes=32 * 1024 * 1024,          # explicit budget (v7x: 64 MiB physical)
        ),
    )(x_pk, w_pack, b_pack, m_pk)
    return out.reshape(b_pad, d_emb)[:B]


def features_embedding_lookup(ids, table, mask, apply_mask=False, *, bm=256, tv=512,
                              compute_dtype=jnp.bfloat16, out_dtype=jnp.float32):
    """expand=True path. ids:(B,F) int, table:(V,d_emb), mask:(B,F,1)."""
    B, F = ids.shape
    V, d_emb = table.shape
    N = B * F

    bm_eff = min(bm, _round_up(N, 8))
    n_pad = _round_up(N, bm_eff)
    tv_eff = min(tv, _round_up(V, 8))
    v_pad = _round_up(V, tv_eff)

    ids_flat = jnp.zeros((n_pad, 1), jnp.int32).at[:N, 0].set(
        ids.reshape(N).astype(jnp.int32))
    mask_flat = jnp.zeros((n_pad, 1), compute_dtype).at[:N, 0].set(
        mask.reshape(N).astype(compute_dtype))
    table_c = jnp.zeros((v_pad, d_emb), compute_dtype).at[:V].set(
        table.astype(compute_dtype))

    kernel = functools.partial(_lookup_embed_kernel, apply_mask=apply_mask)
    out = pl.pallas_call(
        kernel,
        out_shape=jax.ShapeDtypeStruct((n_pad, d_emb), out_dtype),
        grid_spec=pltpu.PrefetchScalarGridSpec(
            num_scalar_prefetch=0,
            grid=(n_pad // bm_eff, v_pad // tv_eff),    # vocab (reduction) axis last
            in_specs=[
                pl.BlockSpec((bm_eff, 1), lambda i, j: (i, 0)),
                pl.BlockSpec((tv_eff, d_emb), lambda i, j: (j, 0)),
                pl.BlockSpec((bm_eff, 1), lambda i, j: (i, 0)),
            ],
            out_specs=pl.BlockSpec((bm_eff, d_emb), lambda i, j: (i, 0)),
            scratch_shapes=[pltpu.VMEM((bm_eff, d_emb), jnp.float32)],
        ),
        compiler_params=pltpu.CompilerParams(
            dimension_semantics=("parallel", "arbitrary"),
            vmem_limit_bytes=32 * 1024 * 1024,
        ),
    )(ids_flat, table_c, mask_flat)
    # NOTE: out-of-range ids yield zero rows (PyTorch nn.Embedding would raise).
    return out[:N].reshape(B, F, d_emb)


# ----------------------------------------------------------------------------
# Deterministic parameter init (mirrors init='xavier' in the module)
# ----------------------------------------------------------------------------
def xavier_uniform_with_gain(key, shape):
    # torch.nn.init.xavier_uniform_(w, gain=sqrt(6/sum(shape))) -> bound = 6/sum(shape)
    bound = 6.0 / float(np.sum(shape))
    return jax.random.uniform(key, shape, jnp.float32, minval=-bound, maxval=bound)


if __name__ == "__main__":
    key = jax.random.PRNGKey(0)
    k_w, k_b, k_x, k_m, k_tab, k_ids, k_m2 = jax.random.split(key, 7)

    # ---------------- expand=False (nn.Linear) ----------------
    B, D_IN, D_EMB = 16, 32, 64            # d_emb=64 exercises the p=2 lane-packing path
    w = xavier_uniform_with_gain(k_w, (D_EMB, D_IN))   # PyTorch Linear layout (out, in)
    w_t = w.T
    b = jax.random.uniform(k_b, (D_EMB,), jnp.float32,
                           minval=-1.0 / np.sqrt(D_IN), maxval=1.0 / np.sqrt(D_IN))
    x = jax.random.normal(k_x, (B, D_IN), jnp.float32)
    mask_lin = (jax.random.uniform(k_m, (B, D_EMB)) > 0.5).astype(jnp.float32)

    out_lin = jax.block_until_ready(
        features_embedding_linear(x, w_t, b, mask_lin, apply_mask=True))
    # Reference with the same bf16-rounded operands (kernel accumulates in f32).
    x16 = x.astype(jnp.bfloat16).astype(jnp.float32)
    w16 = w_t.astype(jnp.bfloat16).astype(jnp.float32)
    m16 = mask_lin.astype(jnp.bfloat16).astype(jnp.float32)
    ref_lin = (x16 @ w16 + b) * m16
    assert out_lin.shape == (B, D_EMB)
    assert bool(jnp.allclose(out_lin, ref_lin, atol=1e-5, rtol=1e-3)), "linear path mismatch"

    # ---------------- expand=True (nn.Embedding) ----------------
    B2, F, VOCAB, D_EMB2 = 2, 8, 32, 128   # d_emb multiple of 128 -> lane-dense output
    table = xavier_uniform_with_gain(k_tab, (VOCAB, D_EMB2))
    ids = jax.random.randint(k_ids, (B2, F), 0, VOCAB, dtype=jnp.int32)
    mask_emb = (jax.random.uniform(k_m2, (B2, F, 1)) > 0.5).astype(jnp.float32)

    out_emb = jax.block_until_ready(
        features_embedding_lookup(ids, table, mask_emb, apply_mask=True))
    t16 = table.astype(jnp.bfloat16).astype(jnp.float32)
    ref_emb = t16[ids] * mask_emb
    assert out_emb.shape == (B2, F, D_EMB2)
    assert bool(jnp.allclose(out_emb, ref_emb, atol=1e-5, rtol=1e-5)), "embedding path mismatch"

    print("KERNEL_OK")
</pallas_src>

<mosaic_0001>
module attributes {stable_mosaic.version = 11 : i64} {
  func.func @_linear_embed_kernel(%arg0: i32, %arg1: memref<8x64xbf16, #tpu.memory_space<vmem>>, %arg2: memref<64x128xbf16, #tpu.memory_space<vmem>>, %arg3: memref<1x128xf32, #tpu.memory_space<vmem>>, %arg4: memref<8x128xbf16, #tpu.memory_space<vmem>>, %arg5: memref<8x128xf32, #tpu.memory_space<vmem>>) attributes {dimension_semantics = [#tpu.dimension_semantics<parallel>], iteration_bounds = array<i64: 1>, scalar_prefetch = 0 : i64, scratch_operands = 0 : i64, tpu.core_type = #tpu.core_type<tc>, window_params = [{transform_indices = @transform_0, window_bounds = array<i64: 8, 64>}, {pipeline_mode = #tpu.pipeline_mode<synchronous>, transform_indices = @transform_1, window_bounds = array<i64: 64, 128>}, {pipeline_mode = #tpu.pipeline_mode<synchronous>, transform_indices = @transform_2, window_bounds = array<i64: 1, 128>}, {transform_indices = @transform_3, window_bounds = array<i64: 8, 128>}, {transform_indices = @transform_4, window_bounds = array<i64: 8, 128>}]} {
    %c0 = arith.constant 0 : index
    %c0_0 = arith.constant 0 : index
    %0 = vector.load %arg1[%c0, %c0_0] : memref<8x64xbf16, #tpu.memory_space<vmem>>, vector<8x64xbf16>
    %c0_1 = arith.constant 0 : index
    %c0_2 = arith.constant 0 : index
    %1 = vector.load %arg2[%c0_1, %c0_2] : memref<64x128xbf16, #tpu.memory_space<vmem>>, vector<64x128xbf16>
    %cst = arith.constant dense<0.000000e+00> : vector<8x128xf32>
    %2 = tpu.matmul %0, %1, %cst {dimension_numbers = #tpu.dot_dimension_numbers<[1], [0], [0], [1], [0, 0, 1, 1], [], []>} : vector<8x64xbf16>, vector<64x128xbf16>, vector<8x128xf32> -> vector<8x128xf32>
    %c0_3 = arith.constant 0 : index
    %c0_4 = arith.constant 0 : index
    %3 = vector.load %arg3[%c0_3, %c0_4] : memref<1x128xf32, #tpu.memory_space<vmem>>, vector<1x128xf32>
    %4 = vector.broadcast %3 : vector<1x128xf32> to vector<8x128xf32>
    %5 = arith.addf %2, %4 : vector<8x128xf32>
    %c0_5 = arith.constant 0 : index
    %c0_6 = arith.constant 0 : index
    %6 = vector.load %arg4[%c0_5, %c0_6] : memref<8x128xbf16, #tpu.memory_space<vmem>>, vector<8x128xbf16>
    %7 = arith.extf %6 : vector<8x128xbf16> to vector<8x128xf32>
    %8 = arith.mulf %5, %7 : vector<8x128xf32>
    %c0_7 = arith.constant 0 : index
    %c0_8 = arith.constant 0 : index
    %9 = vector.load %arg5[%c0_7, %c0_8] : memref<8x128xf32, #tpu.memory_space<vmem>>, vector<8x128xf32>
    tpu.vector_store %arg5[%c0_7, %c0_8], %8 {strides = array<i32>} : memref<8x128xf32, #tpu.memory_space<vmem>>, vector<8x128xf32>,
    return
  }
  func.func @transform_0(%arg0: i32) -> (i32, i32) {
    %c0_i32 = arith.constant 0 : i32
    %c0_i32_0 = arith.constant 0 : i32
    return %arg0, %c0_i32 : i32, i32
  }
  func.func @transform_1(%arg0: i32) -> (i32, i32) {
    %c0_i32 = arith.constant 0 : i32
    %c0_i32_0 = arith.constant 0 : i32
    %c0_i32_1 = arith.constant 0 : i32
    return %c0_i32, %c0_i32_0 : i32, i32
  }
  func.func @transform_2(%arg0: i32) -> (i32, i32) {
    %c0_i32 = arith.constant 0 : i32
    %c0_i32_0 = arith.constant 0 : i32
    %c0_i32_1 = arith.constant 0 : i32
    return %c0_i32, %c0_i32_0 : i32, i32
  }
  func.func @transform_3(%arg0: i32) -> (i32, i32) {
    %c0_i32 = arith.constant 0 : i32
    %c0_i32_0 = arith.constant 0 : i32
    return %arg0, %c0_i32 : i32, i32
  }
  func.func @transform_4(%arg0: i32) -> (i32, i32) {
    %c0_i32 = arith.constant 0 : i32
    %c0_i32_0 = arith.constant 0 : i32
    return %arg0, %c0_i32 : i32, i32
  }
}

</mosaic_0001>

<bundles_post_ra>
// kernel: tpu_custom_call.1
= control target key start
LH: loop header
LB: loop body
LE: loop exit
PB: predicated region body
PF: predicated region fallthrough
CT: control target
= control target key end

     0   :  { %9 = vsyncpa [#allocation3], 0  ;;  %s314_s0 = inlined_call_operand.hbm [shape: bf16[8,64], index: 0, kind: input, shape index: {}]   ;;  %s315_s1 = inlined_call_operand.hbm [shape: bf16[64,128], index: 1, kind: input, shape index: {}]   ;;  %s316_s2 = inlined_call_operand.vmem [shape: f32[1,128], index: 2, kind: input, shape index: {}]   ;;  %s317_s3 = inlined_call_operand.hbm [shape: bf16[8,128], index: 3, kind: input, shape index: {}]   ;;  %s318_s4 = inlined_call_operand.hbm [shape: f32[8,128], index: 4, kind: output, shape index: {}]  }
   0x1   :  { %10 = vsyncpa [#allocation6], 0  ;;  %s27_s17 = sshll.u32 %s315_s1, 4  ;;  %s28_s17 = int_to_ptr.hbm [resolvable:$true] %s27_s17 }
   0x2   :  { %11 = vsyncpa [#allocation4], 0  ;;  %s268_s18 = smov [#allocation5]   ;;  %s17_s22 = sshll.u32 %s314_s0, 4  ;;  %s18_s22 = int_to_ptr.hbm [resolvable:$true] %s17_s22 }
   0x3   :  { %s29_s19 = sshll.u32 %s268_s18, 4  ;;  %s269_s23 = smov 64   ;;  %s30_s19 = int_to_ptr.vmem [resolvable:$true] %s29_s19 }
   0x4   :  { %s270_s24 = smov 4   ;;  %s271_s25 = smov [#allocation2]  }
   0x5   :  { %35 = dma.hbm_to_vmem [thread:$0]  %s28_s17, 512, %s30_s19, [#allocation6], %s269_s23, %s269_s23, %s270_s24  }
   0x6   :  { %s19_s26 = sshll.u32 %s271_s25, 4  ;;  %s43_s29 = sshll.u32 %s317_s3, 4  ;;  %s20_s26 = int_to_ptr.vmem [resolvable:$true] %s19_s26  ;;  %s44_s29 = int_to_ptr.hbm [resolvable:$true] %s43_s29 }
   0x7   :  { %22 = dma.hbm_to_vmem [thread:$0]  %s18_s22, 64, %s20_s26, [#allocation3]  }
   0x8   :  { %s272_s1 = smov [#allocation7]  }
   0x9   :  { %s45_s30 = sshll.u32 %s272_s1, 4  ;;  %s46_s30 = int_to_ptr.vmem [resolvable:$true] %s45_s30 }
   0xa   :  { %48 = dma.hbm_to_vmem [thread:$0]  %s44_s29, 64, %s46_s30, [#allocation6]  }
   0xb   :  { %262 = dma.done.wait [#allocation3], 64  }
   0xc   :  { %263 = vsyncadd [#allocation3], 4294967232 }
   0xd   :  { %264 = dma.done.wait [#allocation6], 576  }
   0xe   :  { %265 = vsyncadd [#allocation6], 4294966720  ;;  %v158_v0 = vld [vmem:[#allocation5 + $0x18] sm:$0xff]  ;;  %v157_v1 = vld [vmem:[#allocation5 + $0x10] sm:$0xff]  ;;  %vm99_vm0 = vcmask 523264   ;;  %s273_s5 = smov [#allocation8]  }
   0xf   :  { %107 = vmatpush.bf16.msra.mxu0 %v158_v0  ;;  %v156_v2 = vld [vmem:[#allocation5 + $0x8] sm:$0xff]  ;;  %v155_v3 = vld [vmem:[#allocation5] sm:$0xff]  ;;  %v62_v4 = vld [vmem:[#allocation2] sm:$0xf]  ;;  %s125_s6 = sshll.u32 %s273_s5, 4  ;;  %s127_s9 = sshll.u32 %s318_s4, 4  ;;  %s126_s6 = int_to_ptr.vmem [resolvable:$true] %s125_s6  ;;  %s128_s9 = int_to_ptr.hbm [resolvable:$true] %s127_s9 }
  0x10   :  { %v116_v5 = vld [vmem:[#allocation7] sm:$0xf]  ;;  %v165_v6 = vld [vmem:[%s316_s2] ss:$0 sm:$0xff] }
  0x11   :  { %v117_v7 = vunpack.c.l.bf16 %v116_v5 }
  0x13   :  { %108 = vmatpush.bf16.msra.mxu0 %v157_v1 }
  0x17   :  { %109 = vmatpush.bf16.msra.mxu0 %v156_v2 }
  0x1b   :  { %110 = vmatpush.bf16.msra.mxu0 %v155_v3 }
  0x1e   :  { %154 = vmatmul.msk.bf16.vlgmr.msra.gmra.mxu0 %vm99_vm0, %v62_v4 }
  0x9b   :  { %v112_v8 = vpop.f32.mrf.mxu0 }
  0x9c   :  { %v113_v9 = vadd.f32 %v165_v6, %v112_v8 }
  0x9e   :  { %v118_v10 = vmul.f32 %v117_v7, %v113_v9 }
  0xa0   :  { %119 = vst [vmem:[#allocation8] sm:$0xff] %v118_v10 }
  0xa1   :  { %130 = dma.vmem_to_hbm [thread:$0]  %s126_s6, 128, %s128_s9, [#allocation4]  }
  0xa3   :  { %v114_v11 = vpop.f32.mrf.mxu0 }
  0xa4   :  { %266 = dma.done.wait [#allocation4], 128  }
  0xa5   :  { %267 = vsyncadd [#allocation4], 4294967168 }
  0xa6   :  { %135 = vsyncpa [#allocation3], 1 }
  0xa7   :  { %136 = vsyncpa [#allocation6], 1 }
  0xa8   :  { %137 = vsyncpa [#allocation4], 1 }

</bundles_post_ra>
